<compile_context>
chip_gen: v6e
topology: v6e:2x2x1
jax: 0.10.0
libtpu: 0.0.40
codegen_flags: <defaults>
</compile_context>

<pallas_src>
import jax
import jax.numpy as jnp
from jax.experimental import pallas as pl
from jax.experimental.pallas import tpu as pltpu

LANE = 128              # TPU vreg lane width (last dim)
SUBLANE = 8             # TPU vreg sublane count (second-to-last dim)
PACKED_ROW_TILE = 1024  # packed rows per grid step (= 4096 original rows)


def _round_up(n, m):
    return ((n + m - 1) // m) * m


def linear_relu_kernel(x_ref, w_ref, b_ref, o_ref):
    # MXU matmul (f32 accumulation) + bias add + ReLU, all resident in VMEM.
    y = jnp.dot(x_ref[...], w_ref[...], preferred_element_type=jnp.float32)
    o_ref[...] = jnp.maximum(y + b_ref[...], 0.0).astype(o_ref.dtype)


def pack_params(w, b):
    """Build the lane-packed (block-diagonal) weight and tiled bias ONCE.

    w: (IN, OUT), b: (OUT,).  If IN divides 128, pack = 128 // IN rows of x are
    packed into one 128-lane row and the weight becomes a (pack*IN, pack*OUT)
    block-diagonal matrix with `pack` copies of w on the diagonal.
    """
    in_features, out_features = w.shape
    pack = LANE // in_features if (in_features < LANE and LANE % in_features == 0) else 1
    if pack == 1:
        return w, b.reshape(1, out_features)
    w_blk = jnp.zeros((pack * in_features, pack * out_features), w.dtype)
    for j in range(pack):
        w_blk = w_blk.at[j * in_features:(j + 1) * in_features,
                         j * out_features:(j + 1) * out_features].set(w)
    b_blk = jnp.tile(b, pack).reshape(1, pack * out_features)
    return w_blk, b_blk


@jax.jit
def my_module_list_forward(x, w_blk, b_blk):
    """x: (..., IN) f32; w_blk/b_blk from pack_params -> relu(x @ W + b)."""
    *lead, in_features = x.shape
    rows = 1
    for d in lead:
        rows *= d
    k_packed, n_packed = w_blk.shape
    pack = k_packed // in_features
    out_features = n_packed // pack

    x2d = x.reshape(rows, in_features)
    pad = (-rows) % pack
    if pad:  # only when rows % pack != 0 (adds <= pack-1 rows)
        x2d = jnp.pad(x2d, ((0, pad), (0, 0)))
    packed_rows = (rows + pad) // pack
    xp = x2d.reshape(packed_rows, k_packed)   # row-major view, no data movement

    # Honest advisory cost: actual MXU flops and actual (lane-dense) HBM bytes.
    cost = pl.CostEstimate(
        flops=2 * packed_rows * k_packed * n_packed,
        transcendentals=0,
        bytes_accessed=4 * (packed_rows * k_packed + k_packed * n_packed
                            + n_packed + packed_rows * n_packed),
    )
    out_shape = jax.ShapeDtypeStruct((packed_rows, n_packed), jnp.float32)

    if packed_rows <= PACKED_ROW_TILE:
        # Small case: one gridless whole-array call, everything resident in VMEM.
        outp = pl.pallas_call(
            linear_relu_kernel,
            out_shape=out_shape,
            cost_estimate=cost,
        )(xp, w_blk, b_blk)
    else:
        # Large case: stream row tiles, keep weight/bias resident (index_map -> 0),
        # force >= 2 blocks so the "parallel" axis can shard over v7x's 2 TCs.
        # Ragged last block (cdiv grid) is masked on write by Pallas; garbage
        # rows in the boundary block are row-independent and never reach HBM.
        rt = min(PACKED_ROW_TILE, _round_up(pl.cdiv(packed_rows, 2), SUBLANE))
        grid = (pl.cdiv(packed_rows, rt),)
        # If profiling on v5e shows exposed input DMA, add
        # pipeline_mode=pl.Buffered(3) to the x BlockSpec only (measure first).
        outp = pl.pallas_call(
            linear_relu_kernel,
            out_shape=out_shape,
            grid=grid,
            in_specs=[
                pl.BlockSpec((rt, k_packed), lambda i: (i, 0)),
                pl.BlockSpec((k_packed, n_packed), lambda i: (0, 0)),
                pl.BlockSpec((1, n_packed), lambda i: (0, 0)),
            ],
            out_specs=pl.BlockSpec((rt, n_packed), lambda i: (i, 0)),
            compiler_params=pltpu.CompilerParams(
                dimension_semantics=("parallel",),
            ),
            cost_estimate=cost,
        )(xp, w_blk, b_blk)

    out2d = outp.reshape(packed_rows * pack, out_features)
    if pad:
        out2d = out2d[:rows]
    return out2d.reshape(*lead, out_features)


if __name__ == "__main__":
    key = jax.random.PRNGKey(0)
    kx, kw, kb, kx2 = jax.random.split(key, 4)

    B, S, IN, OUT = 8, 3, 32, 64   # matches x = torch.randn(8, 3, 32), Linear(32, 64)

    # Deterministic nn.Linear-style init: U(-1/sqrt(IN), 1/sqrt(IN)).
    bound = 1.0 / (IN ** 0.5)
    w = jax.random.uniform(kw, (IN, OUT), minval=-bound, maxval=bound, dtype=jnp.float32)
    b = jax.random.uniform(kb, (OUT,), minval=-bound, maxval=bound, dtype=jnp.float32)

    # Hoisted out of the forward path (done once at "module init").
    w_blk, b_blk = jax.block_until_ready(pack_params(w, b))

    # --- Module-sized case (gridless path). ---
    x = jax.random.normal(kx, (B, S, IN), dtype=jnp.float32)
    out = jax.block_until_ready(my_module_list_forward(x, w_blk, b_blk))
    ref = jnp.maximum(jnp.einsum("bsi,io->bso", x, w) + b, 0.0)
    assert out.shape == (B, S, OUT)
    assert jnp.allclose(out, ref, atol=1e-5, rtol=1e-5)

    # --- Larger batch to exercise the tiled "parallel" row-grid path. ---
    B2, S2 = 256, 32   # 8192 rows -> 2048 packed rows -> grid=(2,) at tile 1024
    x_big = jax.random.normal(kx2, (B2, S2, IN), dtype=jnp.float32)
    out_big = jax.block_until_ready(my_module_list_forward(x_big, w_blk, b_blk))
    ref_big = jnp.maximum(jnp.einsum("bsi,io->bso", x_big, w) + b, 0.0)
    assert out_big.shape == (B2, S2, OUT)
    assert jnp.allclose(out_big, ref_big, atol=1e-5, rtol=1e-5)

    print("KERNEL_OK")
</pallas_src>

<mosaic_0001>
module attributes {stable_mosaic.version = 11 : i64} {
  func.func @linear_relu_kernel(%arg0: memref<6x128xf32, #tpu.memory_space<vmem>>, %arg1: memref<128x256xf32, #tpu.memory_space<vmem>>, %arg2: memref<1x256xf32, #tpu.memory_space<vmem>>, %arg3: memref<6x256xf32, #tpu.memory_space<vmem>>) attributes {dimension_semantics = [], scalar_prefetch = 0 : i64, scratch_operands = 0 : i64, tpu.core_type = #tpu.core_type<tc>} {
    %c0 = arith.constant 0 : index
    %c0_0 = arith.constant 0 : index
    %0 = vector.load %arg0[%c0, %c0_0] : memref<6x128xf32, #tpu.memory_space<vmem>>, vector<6x128xf32>
    %c0_1 = arith.constant 0 : index
    %c0_2 = arith.constant 0 : index
    %1 = vector.load %arg1[%c0_1, %c0_2] : memref<128x256xf32, #tpu.memory_space<vmem>>, vector<128x256xf32>
    %cst = arith.constant dense<0.000000e+00> : vector<6x256xf32>
    %2 = tpu.matmul %0, %1, %cst {dimension_numbers = #tpu.dot_dimension_numbers<[1], [0], [0], [1], [0, 0, 1, 1], [], []>} : vector<6x128xf32>, vector<128x256xf32>, vector<6x256xf32> -> vector<6x256xf32>
    %c0_3 = arith.constant 0 : index
    %c0_4 = arith.constant 0 : index
    %3 = vector.load %arg2[%c0_3, %c0_4] : memref<1x256xf32, #tpu.memory_space<vmem>>, vector<1x256xf32>
    %4 = vector.broadcast %3 : vector<1x256xf32> to vector<6x256xf32>
    %5 = arith.addf %2, %4 : vector<6x256xf32>
    %cst_5 = arith.constant 0.000000e+00 : f32
    %6 = vector.broadcast %cst_5 : f32 to vector<6x256xf32>
    %7 = arith.maximumf %5, %6 : vector<6x256xf32>
    %c0_6 = arith.constant 0 : index
    %c0_7 = arith.constant 0 : index
    %8 = vector.load %arg3[%c0_6, %c0_7] : memref<6x256xf32, #tpu.memory_space<vmem>>, vector<6x256xf32>
    tpu.vector_store %arg3[%c0_6, %c0_7], %7 {strides = array<i32>} : memref<6x256xf32, #tpu.memory_space<vmem>>, vector<6x256xf32>,
    return
  }
}

</mosaic_0001>

<bundles_post_ra>
// kernel: my_module_list_forward.1
= control target key start
LH: loop header
LB: loop body
LE: loop exit
PB: predicated region body
PF: predicated region fallthrough
CT: control target
= control target key end

     0   :  { %8 = vsyncpa [#allocation3], 0  ;;  %s179_s12 = smov [#allocation2]   ;;  %s218_s0 = inlined_call_operand.vmem [shape: f32[6,128], index: 0, kind: input, shape index: {}]   ;;  %s219_s1 = inlined_call_operand.hbm [shape: f32[128,256], index: 1, kind: input, shape index: {}]   ;;  %s220_s2 = inlined_call_operand.vmem [shape: f32[1,256], index: 2, kind: input, shape index: {}]   ;;  %s221_s3 = inlined_call_operand.vmem [shape: f32[6,256], index: 3, kind: output, shape index: {}]  }
   0x1   :  { %s16_s13 = sshll.u32 %s179_s12, 4  ;;  %s17_s13 = int_to_ptr.vmem [resolvable:$true] %s16_s13 }
   0x2   :  { %s165_s14 = scalar_lea.vmem %s17_s13, 4096  ;;  %p170_p1 = scmp.lt.s32.totalorder %s17_s13, %s17_s13 }
   0x3   :  { %p166_p0 = scmp.ne.s32.totalorder %s17_s13, %s165_s14  ;;  %p171_p2 = scmp.lt.s32.totalorder %s165_s14, %s165_s14 }
   0x5   :  { %p172_p3 = por %p171_p2, %p170_p1 }
   0x7   :  { %p173_p4 = pnand %p172_p3, %p166_p0 }
   0x9   :  { %176 = shalt.err (!%p173_p4)
}
   0xa   :  { %s180_s15 = smov 256   ;;  %s181_s16 = smov 16  }
   0xb   :  { %22 = dma.hbm_to_vmem [thread:$0]  %s219_s1, 4096, %s17_s13, [#allocation3], %s180_s15, %s180_s15, %s181_s16  }
   0xc   :  { %177 = dma.done.wait [#allocation3], 4096  }
   0xd   :  { %178 = vsyncadd [#allocation3], 4294963200  ;;  %v182_v0 = vmov 0.0   ;;  %v60_v1 = vld [vmem:[#allocation2 + $0xf8] sm:$0xff]  ;;  %v59_v2 = vld [vmem:[#allocation2 + $0xf0] sm:$0xff]  ;;  %v63_v34 = vlaneseq }
   0xe   :  { %137 = vmatprep.mubr.f32.mxu0 %v182_v0  ;;  %v58_v3 = vld [vmem:[#allocation2 + $0xe8] sm:$0xff]  ;;  %73 = vmatprep.subr.mxu0 %v60_v1  ;;  %v57_v4 = vld [vmem:[#allocation2 + $0xe0] sm:$0xff]  ;;  %v56_v5 = vld [vmem:[#allocation2 + $0xd8] sm:$0xff] }
   0xf   :  { %74 = vmatpush1.msra.mxu0 %v59_v2  ;;  %v55_v6 = vld [vmem:[#allocation2 + $0xd0] sm:$0xff]  ;;  %v54_v7 = vld [vmem:[#allocation2 + $0xc8] sm:$0xff]  ;;  %v53_v8 = vld [vmem:[#allocation2 + $0xc0] sm:$0xff]  ;;  %v64_v35 = vshrl.u32 %v63_v34, 7 }
  0x10   :  { %75 = vmatprep.subr.mxu0 %v58_v3  ;;  %v52_v9 = vld [vmem:[#allocation2 + $0xb8] sm:$0xff]  ;;  %v51_v10 = vld [vmem:[#allocation2 + $0xb0] sm:$0xff]  ;;  %v50_v11 = vld [vmem:[#allocation2 + $0xa8] sm:$0xff] }
  0x11   :  { %76 = vmatpush1.msra.mxu0 %v57_v4  ;;  %v49_v12 = vld [vmem:[#allocation2 + $0xa0] sm:$0xff]  ;;  %v48_v13 = vld [vmem:[#allocation2 + $0x98] sm:$0xff]  ;;  %v47_v14 = vld [vmem:[#allocation2 + $0x90] sm:$0xff]  ;;  %v65_v36 = vsub.s32 0, %v64_v35  ;;  %v69_v38 = vsub.s32 1, %v64_v35 }
  0x12   :  { %77 = vmatprep.subr.mxu0 %v56_v5  ;;  %v46_v15 = vld [vmem:[#allocation2 + $0x88] sm:$0xff]  ;;  %v45_v16 = vld [vmem:[#allocation2 + $0x80] sm:$0xff]  ;;  %v44_v17 = vld [vmem:[#allocation2 + $0x78] sm:$0xff] }
  0x13   :  { %78 = vmatpush1.msra.mxu0 %v55_v6  ;;  %v43_v18 = vld [vmem:[#allocation2 + $0x70] sm:$0xff]  ;;  %v42_v19 = vld [vmem:[#allocation2 + $0x68] sm:$0xff]  ;;  %v41_v20 = vld [vmem:[#allocation2 + $0x60] sm:$0xff] }
  0x14   :  { %79 = vmatprep.subr.mxu0 %v54_v7  ;;  %v40_v21 = vld [vmem:[#allocation2 + $0x58] sm:$0xff]  ;;  %v39_v22 = vld [vmem:[#allocation2 + $0x50] sm:$0xff]  ;;  %v38_v23 = vld [vmem:[#allocation2 + $0x48] sm:$0xff] }
  0x15   :  { %80 = vmatpush1.msra.mxu0 %v53_v8  ;;  %v37_v24 = vld [vmem:[#allocation2 + $0x40] sm:$0xff]  ;;  %v36_v25 = vld [vmem:[#allocation2 + $0x38] sm:$0xff]  ;;  %v35_v26 = vld [vmem:[#allocation2 + $0x30] sm:$0xff] }
  0x16   :  { %81 = vmatprep.subr.mxu0 %v52_v9  ;;  %v34_v27 = vld [vmem:[#allocation2 + $0x28] sm:$0xff]  ;;  %v33_v28 = vld [vmem:[#allocation2 + $0x20] sm:$0xff]  ;;  %v32_v29 = vld [vmem:[#allocation2 + $0x18] sm:$0xff] }
  0x17   :  { %82 = vmatpush1.msra.mxu0 %v51_v10  ;;  %v31_v30 = vld [vmem:[#allocation2 + $0x10] sm:$0xff]  ;;  %v30_v31 = vld [vmem:[#allocation2 + $0x8] sm:$0xff]  ;;  %v29_v32 = vld [vmem:[#allocation2] sm:$0xff] }
  0x18   :  { %83 = vmatprep.subr.mxu0 %v50_v11  ;;  %v28_v33 = vld [vmem:[%s218_s0] sm:$0x3f] }
  0x19   :  { %84 = vmatpush1.msra.mxu0 %v49_v12  ;;  %v61_v37 = vld [vmem:[%s220_s2] sm:$0x3] }
  0x1a   :  { %85 = vmatprep.subr.mxu0 %v48_v13  ;;  %v66_v39 = vrot.slane %v61_v37, %v65_v36  ;;  %v70_v40 = vrot.slane %v61_v37, %v69_v38 }
  0x1b   :  { %86 = vmatpush1.msra.mxu0 %v47_v14 }
  0x1c   :  { %87 = vmatprep.subr.mxu0 %v46_v15 }
  0x1d   :  { %88 = vmatpush1.msra.mxu0 %v45_v16 }
  0x1e   :  { %89 = vmatprep.subr.mxu0 %v44_v17 }
  0x1f   :  { %90 = vmatpush1.msra.mxu0 %v43_v18 }
  0x20   :  { %91 = vmatprep.subr.mxu0 %v42_v19 }
  0x21   :  { %92 = vmatpush1.msra.mxu0 %v41_v20 }
  0x22   :  { %93 = vmatprep.subr.mxu0 %v40_v21 }
  0x23   :  { %94 = vmatpush1.msra.mxu0 %v39_v22 }
  0x24   :  { %95 = vmatprep.subr.mxu0 %v38_v23 }
  0x25   :  { %96 = vmatpush1.msra.mxu0 %v37_v24 }
  0x26   :  { %97 = vmatprep.subr.mxu0 %v36_v25 }
  0x27   :  { %98 = vmatpush1.msra.mxu0 %v35_v26 }
  0x28   :  { %99 = vmatprep.subr.mxu0 %v34_v27 }
  0x29   :  { %100 = vmatpush1.msra.mxu0 %v33_v28 }
  0x2a   :  { %101 = vmatprep.subr.mxu0 %v32_v29 }
  0x2b   :  { %102 = vmatpush1.msra.mxu0 %v31_v30 }
  0x2c   :  { %103 = vmatprep.subr.mxu0 %v30_v31 }
  0x2d   :  { %104 = vmatpush1.msra.mxu0 %v29_v32 }
  0x2e   :  { %138 = vmatmul.mubr.f32.vlgmr.msra.gmra.mxu0 %v28_v33 }
  0xee   :  { %v139_v41 = vpop.f32.mrf.mxu0 }
  0xef   :  { %v140_v42 = vadd.f32 %v139_v41, %v66_v39 }
  0xf0   :  { %v141_v43 = vpop.f32.mrf.mxu0 }
  0xf1   :  { %v144_v44 = vmax.f32 %v140_v42, 0.0  ;;  %v142_v45 = vadd.f32 %v141_v43, %v70_v40 }
  0xf3   :  { %146 = vst [vmem:[%s221_s3] sm:$0x3f] %v144_v44  ;;  %v145_v46 = vmax.f32 %v142_v45, 0.0 }
  0xf5   :  { %147 = vst [vmem:[%s221_s3 + $0x8] sm:$0x3f] %v145_v46 }
  0xf6   :  { %152 = vsyncpa [#allocation3], 1 }

</bundles_post_ra>
